<compile_context>
chip_gen: v5e
topology: v5e:2x2
jax: 0.10.0
libtpu: 0.0.40
codegen_flags: <defaults>
</compile_context>

<pallas_src>
import functools

import jax
import jax.numpy as jnp
from jax import lax
from jax.experimental import pallas as pl
from jax.experimental.pallas import tpu as pltpu

IN_DIM = 5
HID_DIM = 20
OUT_DIM = 1

_LANE_ALIGN = 512                      # multiple of 128; 256-wide-MXU friendly
_VMEM_LIMIT_BYTES = 32 * 1024 * 1024   # explicit so large tiles also fit v5e


def _round_up(n, m):
    return ((n + m - 1) // m) * m


def _bf16_vector_units_available():
    """bf16 VPU/EUP exist on TPU v6 and later; v2-v5 use the f32 path."""
    try:
        kind = jax.devices()[0].device_kind.lower()
    except Exception:
        return False
    if "tpu" not in kind:
        return False
    return not any(old in kind for old in ("v2", "v3", "v4", "v5"))


def _choose_block_b(batch, max_block_b):
    align = _LANE_ALIGN if max_block_b >= _LANE_ALIGN else 128
    max_block_b = max(align, (max_block_b // align) * align)
    block = min(_round_up(batch, align), max_block_b)
    # Keep >= 2 grid steps for large batches so v7x's two TensorCores both get
    # work (the grid axis is marked "parallel"); harmless on single-TC v5e/v6e.
    if batch >= 2048 and pl.cdiv(batch, block) < 2:
        block = min(max_block_b, _round_up(pl.cdiv(batch, 2), align))
    return block


def _mlp_kernel(x_ref, w1_ref, b1_ref, w2_ref, b2_ref, w3_ref, b3_ref, o_ref,
                *, act_dtype):
    # x_ref: (block_b, IN_DIM) natural row layout.  Layer 1 contracts the
    # size-5 feature axis of both operands (w1 . x^T), so the result is
    # (HID_DIM, block_b) with the batch in the lane axis -- the relayout
    # happens entirely in VMEM instead of an extra HBM pass.
    h = lax.dot_general(
        w1_ref[...], x_ref[...],
        dimension_numbers=(((1,), (1,)), ((), ())),
        preferred_element_type=jnp.float32)               # (20, block_b) f32
    h = jnp.tanh((h + b1_ref[...]).astype(act_dtype))      # EUP (bf16 on v6/v7)
    h = jnp.dot(w2_ref[...], h, preferred_element_type=jnp.float32)
    h = jnp.tanh((h + b2_ref[...]).astype(act_dtype))
    o = jnp.dot(w3_ref[...], h, preferred_element_type=jnp.float32)
    o_ref[...] = (o + b3_ref[...]).astype(o_ref.dtype)     # (1, block_b) lane-dense


@functools.partial(jax.jit, static_argnames=("max_block_b", "use_bf16"))
def functional_encoder(x, w1, b1, w2, b2, w3, b3, *, max_block_b=16384,
                       use_bf16=None):
    """Forward pass of Functional_encoder.

    x : (B, 5) float32
    w1: (20, 5)  b1: (20,)    (PyTorch nn.Linear layout: (out, in))
    w2: (20, 20) b2: (20,)
    w3: (1, 20)  b3: (1,)
    returns (B, 1) float32
    """
    if use_bf16 is None:
        use_bf16 = _bf16_vector_units_available()
    act_dtype = jnp.bfloat16 if use_bf16 else jnp.float32

    B = x.shape[0]
    block_b = _choose_block_b(B, max_block_b)
    grid = (pl.cdiv(B, block_b),)

    x = x.astype(jnp.float32)
    w1f = w1.astype(jnp.float32)          # layer-1 matmul stays f32 (f32 x)
    w2c = w2.astype(act_dtype)
    w3c = w3.astype(act_dtype)
    # Biases as (N, 1) columns so they broadcast along the batch (lane) axis.
    b1c = b1.reshape(HID_DIM, 1).astype(jnp.float32)
    b2c = b2.reshape(HID_DIM, 1).astype(jnp.float32)
    b3c = b3.reshape(OUT_DIM, 1).astype(jnp.float32)

    def resident(shape):
        # Whole (tiny) array, same block every grid step -> stays resident.
        return pl.BlockSpec(shape, lambda i: (0, 0))

    out_t = pl.pallas_call(
        functools.partial(_mlp_kernel, act_dtype=act_dtype),
        out_shape=jax.ShapeDtypeStruct((OUT_DIM, B), jnp.float32),
        grid_spec=pltpu.PrefetchScalarGridSpec(
            num_scalar_prefetch=0,
            grid=grid,
            in_specs=[
                pl.BlockSpec((block_b, IN_DIM), lambda i: (i, 0)),  # x row block
                resident((HID_DIM, IN_DIM)),    # w1
                resident((HID_DIM, 1)),         # b1
                resident((HID_DIM, HID_DIM)),   # w2
                resident((HID_DIM, 1)),         # b2
                resident((OUT_DIM, HID_DIM)),   # w3
                resident((OUT_DIM, 1)),         # b3
            ],
            out_specs=pl.BlockSpec((OUT_DIM, block_b), lambda i: (0, i)),
        ),
        compiler_params=pltpu.CompilerParams(
            dimension_semantics=("parallel",),
            vmem_limit_bytes=_VMEM_LIMIT_BYTES,
        ),
    )(x, w1f, b1c, w2c, b2c, w3c, b3c)

    # Back to the PyTorch convention: (B, 1).
    return out_t.T


def _init_linear(key, fan_in, fan_out):
    # Mimic nn.Linear's uniform(-1/sqrt(fan_in), 1/sqrt(fan_in)); PyTorch layout.
    kw, kb = jax.random.split(key)
    bound = 1.0 / float(fan_in) ** 0.5
    w = jax.random.uniform(kw, (fan_out, fan_in), jnp.float32, -bound, bound)
    b = jax.random.uniform(kb, (fan_out,), jnp.float32, -bound, bound)
    return w, b


def _reference(x, w1, b1, w2, b2, w3, b3):
    h = jnp.tanh(x @ w1.T + b1)
    h = jnp.tanh(h @ w2.T + b2)
    return h @ w3.T + b3


if __name__ == "__main__":
    key = jax.random.PRNGKey(0)
    kx, k1, k2, k3 = jax.random.split(key, 4)

    w1, b1 = _init_linear(k1, IN_DIM, HID_DIM)
    w2, b2 = _init_linear(k2, HID_DIM, HID_DIM)
    w3, b3 = _init_linear(k3, HID_DIM, OUT_DIM)

    # --- Test 1: f32 path, single (masked, oversized) block, odd batch. ---
    B = 200
    x = jax.random.normal(kx, (B, IN_DIM), jnp.float32)
    ref = _reference(x, w1, b1, w2, b2, w3, b3)
    out = jax.block_until_ready(
        functional_encoder(x, w1, b1, w2, b2, w3, b3, use_bf16=False))
    assert out.shape == (B, OUT_DIM)
    assert jnp.allclose(out, ref, atol=2e-5, rtol=2e-5), "f32 mismatch vs reference"

    # --- Test 2: multi-step grid with a partial last block, auto dtype path. ---
    B2 = 1000
    x2 = jax.random.normal(kx, (B2, IN_DIM), jnp.float32)
    ref2 = _reference(x2, w1, b1, w2, b2, w3, b3)
    out2 = jax.block_until_ready(
        functional_encoder(x2, w1, b1, w2, b2, w3, b3, max_block_b=512))
    tol = 5e-2 if _bf16_vector_units_available() else 2e-5
    assert out2.shape == (B2, OUT_DIM)
    assert jnp.allclose(out2, ref2, atol=tol, rtol=tol), "mismatch vs reference"

    print("KERNEL_OK")
</pallas_src>

<mosaic_0001>
module attributes {stable_mosaic.version = 11 : i64} {
  func.func @_mlp_kernel(%arg0: i32, %arg1: memref<512x5xf32, #tpu.memory_space<vmem>>, %arg2: memref<20x5xf32, #tpu.memory_space<vmem>>, %arg3: memref<20x1xf32, #tpu.memory_space<vmem>>, %arg4: memref<20x20xf32, #tpu.memory_space<vmem>>, %arg5: memref<20x1xf32, #tpu.memory_space<vmem>>, %arg6: memref<1x20xf32, #tpu.memory_space<vmem>>, %arg7: memref<1x1xf32, #tpu.memory_space<vmem>>, %arg8: memref<1x512xf32, #tpu.memory_space<vmem>>) attributes {dimension_semantics = [#tpu.dimension_semantics<parallel>], iteration_bounds = array<i64: 1>, scalar_prefetch = 0 : i64, scratch_operands = 0 : i64, tpu.core_type = #tpu.core_type<tc>, window_params = [{transform_indices = @transform_0, window_bounds = array<i64: 512, 5>}, {pipeline_mode = #tpu.pipeline_mode<synchronous>, transform_indices = @transform_1, window_bounds = array<i64: 20, 5>}, {pipeline_mode = #tpu.pipeline_mode<synchronous>, transform_indices = @transform_2, window_bounds = array<i64: 20, 1>}, {pipeline_mode = #tpu.pipeline_mode<synchronous>, transform_indices = @transform_3, window_bounds = array<i64: 20, 20>}, {pipeline_mode = #tpu.pipeline_mode<synchronous>, transform_indices = @transform_4, window_bounds = array<i64: 20, 1>}, {pipeline_mode = #tpu.pipeline_mode<synchronous>, transform_indices = @transform_5, window_bounds = array<i64: 1, 20>}, {pipeline_mode = #tpu.pipeline_mode<synchronous>, transform_indices = @transform_6, window_bounds = array<i64: 1, 1>}, {transform_indices = @transform_7, window_bounds = array<i64: 1, 512>}]} {
    %c0 = arith.constant 0 : index
    %c0_0 = arith.constant 0 : index
    %0 = vector.load %arg2[%c0, %c0_0] : memref<20x5xf32, #tpu.memory_space<vmem>>, vector<20x5xf32>
    %c0_1 = arith.constant 0 : index
    %c0_2 = arith.constant 0 : index
    %1 = vector.load %arg1[%c0_1, %c0_2] : memref<512x5xf32, #tpu.memory_space<vmem>>, vector<512x5xf32>
    %cst = arith.constant dense<0.000000e+00> : vector<20x512xf32>
    %2 = tpu.matmul %0, %1, %cst {dimension_numbers = #tpu.dot_dimension_numbers<[1], [1], [0], [0], [0, 0, 1, 0], [], []>} : vector<20x5xf32>, vector<512x5xf32>, vector<20x512xf32> -> vector<20x512xf32>
    %c0_3 = arith.constant 0 : index
    %c0_4 = arith.constant 0 : index
    %3 = vector.load %arg3[%c0_3, %c0_4] : memref<20x1xf32, #tpu.memory_space<vmem>>, vector<20x1xf32>
    %4 = vector.broadcast %3 : vector<20x1xf32> to vector<20x512xf32>
    %5 = arith.addf %2, %4 : vector<20x512xf32>
    %6 = math.tanh %5 : vector<20x512xf32>
    %c0_5 = arith.constant 0 : index
    %c0_6 = arith.constant 0 : index
    %7 = vector.load %arg4[%c0_5, %c0_6] : memref<20x20xf32, #tpu.memory_space<vmem>>, vector<20x20xf32>
    %cst_7 = arith.constant dense<0.000000e+00> : vector<20x512xf32>
    %8 = tpu.matmul %7, %6, %cst_7 {dimension_numbers = #tpu.dot_dimension_numbers<[1], [0], [0], [1], [0, 0, 1, 1], [], []>} : vector<20x20xf32>, vector<20x512xf32>, vector<20x512xf32> -> vector<20x512xf32>
    %c0_8 = arith.constant 0 : index
    %c0_9 = arith.constant 0 : index
    %9 = vector.load %arg5[%c0_8, %c0_9] : memref<20x1xf32, #tpu.memory_space<vmem>>, vector<20x1xf32>
    %10 = vector.broadcast %9 : vector<20x1xf32> to vector<20x512xf32>
    %11 = arith.addf %8, %10 : vector<20x512xf32>
    %12 = math.tanh %11 : vector<20x512xf32>
    %c0_10 = arith.constant 0 : index
    %c0_11 = arith.constant 0 : index
    %13 = vector.load %arg6[%c0_10, %c0_11] : memref<1x20xf32, #tpu.memory_space<vmem>>, vector<1x20xf32>
    %cst_12 = arith.constant dense<0.000000e+00> : vector<1x512xf32>
    %14 = tpu.matmul %13, %12, %cst_12 {dimension_numbers = #tpu.dot_dimension_numbers<[1], [0], [0], [1], [0, 0, 1, 1], [], []>} : vector<1x20xf32>, vector<20x512xf32>, vector<1x512xf32> -> vector<1x512xf32>
    %c0_13 = arith.constant 0 : index
    %c0_14 = arith.constant 0 : index
    %15 = vector.load %arg7[%c0_13, %c0_14] : memref<1x1xf32, #tpu.memory_space<vmem>>, vector<1x1xf32>
    %16 = vector.broadcast %15 : vector<1x1xf32> to vector<1x512xf32>
    %17 = arith.addf %14, %16 : vector<1x512xf32>
    %c0_15 = arith.constant 0 : index
    %c0_16 = arith.constant 0 : index
    %18 = vector.load %arg8[%c0_15, %c0_16] : memref<1x512xf32, #tpu.memory_space<vmem>>, vector<1x512xf32>
    tpu.vector_store %arg8[%c0_15, %c0_16], %17 {strides = array<i32>} : memref<1x512xf32, #tpu.memory_space<vmem>>, vector<1x512xf32>,
    return
  }
  func.func @transform_0(%arg0: i32) -> (i32, i32) {
    %c0_i32 = arith.constant 0 : i32
    %c0_i32_0 = arith.constant 0 : i32
    return %arg0, %c0_i32 : i32, i32
  }
  func.func @transform_1(%arg0: i32) -> (i32, i32) {
    %c0_i32 = arith.constant 0 : i32
    %c0_i32_0 = arith.constant 0 : i32
    %c0_i32_1 = arith.constant 0 : i32
    return %c0_i32, %c0_i32_0 : i32, i32
  }
  func.func @transform_2(%arg0: i32) -> (i32, i32) {
    %c0_i32 = arith.constant 0 : i32
    %c0_i32_0 = arith.constant 0 : i32
    %c0_i32_1 = arith.constant 0 : i32
    return %c0_i32, %c0_i32_0 : i32, i32
  }
  func.func @transform_3(%arg0: i32) -> (i32, i32) {
    %c0_i32 = arith.constant 0 : i32
    %c0_i32_0 = arith.constant 0 : i32
    %c0_i32_1 = arith.constant 0 : i32
    return %c0_i32, %c0_i32_0 : i32, i32
  }
  func.func @transform_4(%arg0: i32) -> (i32, i32) {
    %c0_i32 = arith.constant 0 : i32
    %c0_i32_0 = arith.constant 0 : i32
    %c0_i32_1 = arith.constant 0 : i32
    return %c0_i32, %c0_i32_0 : i32, i32
  }
  func.func @transform_5(%arg0: i32) -> (i32, i32) {
    %c0_i32 = arith.constant 0 : i32
    %c0_i32_0 = arith.constant 0 : i32
    %c0_i32_1 = arith.constant 0 : i32
    return %c0_i32, %c0_i32_0 : i32, i32
  }
  func.func @transform_6(%arg0: i32) -> (i32, i32) {
    %c0_i32 = arith.constant 0 : i32
    %c0_i32_0 = arith.constant 0 : i32
    %c0_i32_1 = arith.constant 0 : i32
    return %c0_i32, %c0_i32_0 : i32, i32
  }
  func.func @transform_7(%arg0: i32) -> (i32, i32) {
    %c0_i32 = arith.constant 0 : i32
    %c0_i32_0 = arith.constant 0 : i32
    return %c0_i32, %arg0 : i32, i32
  }
}

</mosaic_0001>

<bundles_post_ra>
// kernel: functional_encoder.1
= control target key start
LH: loop header
LB: loop body
LE: loop exit
PB: predicated region body
PF: predicated region fallthrough
CT: control target
= control target key end

     0   :  { %s1288_s0 = inlined_call_operand.vmem [shape: f32[200,5], index: 0, kind: input, shape index: {}]   ;;  %s1289_s1 = inlined_call_operand.vmem [shape: f32[20,5], index: 1, kind: input, shape index: {}]   ;;  %s1290_s2 = inlined_call_operand.vmem [shape: f32[20,1], index: 2, kind: input, shape index: {}]   ;;  %s1291_s3 = inlined_call_operand.vmem [shape: f32[20,20], index: 3, kind: input, shape index: {}]   ;;  %s1292_s4 = inlined_call_operand.vmem [shape: f32[20,1], index: 4, kind: input, shape index: {}]   ;;  %s1293_s5 = inlined_call_operand.vmem [shape: f32[1,20], index: 5, kind: input, shape index: {}]   ;;  %s1294_s6 = inlined_call_operand.<no memory space> [shape: f32[1,1], index: 6, kind: input, shape index: {}]   ;;  %s1295_s7 = inlined_call_operand.hbm [shape: f32[1,200], index: 7, kind: output, shape index: {}]  }
   0x1   :  { %v12_v0 = vstv %s1294_s6 }
   0x2   :  { %13 = vst [vmem:[#allocation2] sm:$0x1] %v12_v0 }
   0x3   :  { %14 = vsyncpa [#allocation4], 0  ;;  %v47_v1 = vld [vmem:[%s1288_s0 + $0x78] sm:$0xff]  ;;  %vm114_vm0 = vcmask 39936   ;;  %v46_v5 = vld [vmem:[%s1288_s0 + $0x70] sm:$0xff]  ;;  %v909_v50 = vmov 0  }
   0x4   :  { %v63_v2 = vld [vmem:[%s1288_s0 + $0xf8] sm:$0xff]  ;;  %730 = vmatpush.xpose.msk.msra.mxu0 %vm114_vm0, %v47_v1  ;;  %v62_v6 = vld [vmem:[%s1288_s0 + $0xf0] sm:$0xff]  ;;  %v45_v9 = vld [vmem:[%s1288_s0 + $0x68] sm:$0xff]  ;;  %832 = vset.pattern.permute.xlu0 %v909_v50  ;;  %vm463_vm1 = vcmask 1043456   ;;  %vm453_vm2 = vcmask 162816   ;;  %vm702_vm3 = vcmask 1040384  }
   0x5   :  { %749 = vmatpush.xpose.msk.msra.mxu1 %vm114_vm0, %v63_v2  ;;  %v79_v3 = vld [vmem:[%s1288_s0 + $0x178] sm:$0xff]  ;;  %v78_v7 = vld [vmem:[%s1288_s0 + $0x170] sm:$0xff]  ;;  %v61_v10 = vld [vmem:[%s1288_s0 + $0xe8] sm:$0xff]  ;;  %833 = vset.pattern.permute.xlu1 %v909_v50  ;;  %vm704_vm4 = vcmask 1042434   ;;  %vm706_vm5 = vcmask 1041408  }
   0x6   :  { %v95_v4 = vld [vmem:[%s1288_s0 + $0x1f8] sm:$0xff]  ;;  %768 = vmatpush.xpose.msk.msra.mxu2 %vm114_vm0, %v79_v3  ;;  %v94_v8 = vld [vmem:[%s1288_s0 + $0x1f0] sm:$0xff]  ;;  %v77_v11 = vld [vmem:[%s1288_s0 + $0x168] sm:$0xff]  ;;  %834 = vset.pattern.permute.xlu2 %v909_v50 }
   0x7   :  { %787 = vmatpush.xpose.msk.msra.mxu3 %vm114_vm0, %v95_v4  ;;  %v93_v12 = vld [vmem:[%s1288_s0 + $0x1e8] sm:$0xff]  ;;  %v44_v13 = vld [vmem:[%s1288_s0 + $0x60] sm:$0xff]  ;;  %v43_v17 = vld [vmem:[%s1288_s0 + $0x58] sm:$0xff] }
   0x8   :  { %731 = vmatpush.xpose.msk.msra.mxu0 %vm114_vm0, %v46_v5  ;;  %v60_v14 = vld [vmem:[%s1288_s0 + $0xe0] sm:$0xff]  ;;  %v59_v18 = vld [vmem:[%s1288_s0 + $0xd8] sm:$0xff]  ;;  %v42_v21 = vld [vmem:[%s1288_s0 + $0x50] sm:$0xff] }
   0x9   :  { %750 = vmatpush.xpose.msk.msra.mxu1 %vm114_vm0, %v62_v6  ;;  %v76_v15 = vld [vmem:[%s1288_s0 + $0x160] sm:$0xff]  ;;  %v75_v19 = vld [vmem:[%s1288_s0 + $0x158] sm:$0xff]  ;;  %v58_v22 = vld [vmem:[%s1288_s0 + $0xd0] sm:$0xff] }
   0xa   :  { %769 = vmatpush.xpose.msk.msra.mxu2 %vm114_vm0, %v78_v7  ;;  %v92_v16 = vld [vmem:[%s1288_s0 + $0x1e0] sm:$0xff]  ;;  %v91_v20 = vld [vmem:[%s1288_s0 + $0x1d8] sm:$0xff]  ;;  %v74_v23 = vld [vmem:[%s1288_s0 + $0x150] sm:$0xff] }
   0xb   :  { %788 = vmatpush.xpose.msk.msra.mxu3 %vm114_vm0, %v94_v8  ;;  %v90_v24 = vld [vmem:[%s1288_s0 + $0x1d0] sm:$0xff]  ;;  %v41_v25 = vld [vmem:[%s1288_s0 + $0x48] sm:$0xff]  ;;  %v40_v29 = vld [vmem:[%s1288_s0 + $0x40] sm:$0xff] }
   0xc   :  { %732 = vmatpush.xpose.msk.msra.mxu0 %vm114_vm0, %v45_v9  ;;  %v57_v26 = vld [vmem:[%s1288_s0 + $0xc8] sm:$0xff]  ;;  %v56_v30 = vld [vmem:[%s1288_s0 + $0xc0] sm:$0xff]  ;;  %v39_v33 = vld [vmem:[%s1288_s0 + $0x38] sm:$0xff] }
   0xd   :  { %751 = vmatpush.xpose.msk.msra.mxu1 %vm114_vm0, %v61_v10  ;;  %v73_v27 = vld [vmem:[%s1288_s0 + $0x148] sm:$0xff]  ;;  %v72_v31 = vld [vmem:[%s1288_s0 + $0x140] sm:$0xff]  ;;  %v55_v34 = vld [vmem:[%s1288_s0 + $0xb8] sm:$0xff] }
   0xe   :  { %770 = vmatpush.xpose.msk.msra.mxu2 %vm114_vm0, %v77_v11  ;;  %v89_v28 = vld [vmem:[%s1288_s0 + $0x1c8] sm:$0xff]  ;;  %v88_v32 = vld [vmem:[%s1288_s0 + $0x1c0] sm:$0xff]  ;;  %v71_v35 = vld [vmem:[%s1288_s0 + $0x138] sm:$0xff] }
   0xf   :  { %789 = vmatpush.xpose.msk.msra.mxu3 %vm114_vm0, %v93_v12  ;;  %v87_v36 = vld [vmem:[%s1288_s0 + $0x1b8] sm:$0xff]  ;;  %v38_v37 = vld [vmem:[%s1288_s0 + $0x30] sm:$0xff]  ;;  %v37_v41 = vld [vmem:[%s1288_s0 + $0x28] sm:$0xff] }
  0x10   :  { %733 = vmatpush.xpose.msk.msra.mxu0 %vm114_vm0, %v44_v13  ;;  %v54_v38 = vld [vmem:[%s1288_s0 + $0xb0] sm:$0xff]  ;;  %v53_v42 = vld [vmem:[%s1288_s0 + $0xa8] sm:$0xff]  ;;  %v36_v46 = vld [vmem:[%s1288_s0 + $0x20] sm:$0xff] }
  0x11   :  { %752 = vmatpush.xpose.msk.msra.mxu1 %vm114_vm0, %v60_v14  ;;  %v70_v39 = vld [vmem:[%s1288_s0 + $0x130] sm:$0xff]  ;;  %v69_v43 = vld [vmem:[%s1288_s0 + $0x128] sm:$0xff]  ;;  %v52_v47 = vld [vmem:[%s1288_s0 + $0xa0] sm:$0xff] }
  0x12   :  { %771 = vmatpush.xpose.msk.msra.mxu2 %vm114_vm0, %v76_v15  ;;  %v86_v40 = vld [vmem:[%s1288_s0 + $0x1b0] sm:$0xff]  ;;  %v85_v44 = vld [vmem:[%s1288_s0 + $0x1a8] sm:$0xff]  ;;  %v68_v48 = vld [vmem:[%s1288_s0 + $0x120] sm:$0xff] }
  0x13   :  { %790 = vmatpush.xpose.msk.msra.mxu3 %vm114_vm0, %v92_v16  ;;  %v98_v45 = vld [vmem:[%s1290_s2 + $0x10] sm:$0xf]  ;;  %v84_v49 = vld [vmem:[%s1288_s0 + $0x1a0] sm:$0xff]  ;;  %v35_v51 = vld [vmem:[%s1288_s0 + $0x18] sm:$0xff] }
  0x14   :  { %734 = vmatpush.xpose.msk.msra.mxu0 %vm114_vm0, %v43_v17  ;;  %111 = vperm.xlu0 %832, %v98_v45   ;;  %v51_v52 = vld [vmem:[%s1288_s0 + $0x98] sm:$0xff]  ;;  %v96_v55 = vld [vmem:[%s1290_s2] sm:$0xff]  ;;  %v97_v56 = vld [vmem:[%s1290_s2 + $0x8] sm:$0xff] }
  0x15   :  { %753 = vmatpush.xpose.msk.msra.mxu1 %vm114_vm0, %v59_v18  ;;  %v67_v53 = vld [vmem:[%s1288_s0 + $0x118] sm:$0xff]  ;;  %v34_v57 = vld [vmem:[%s1288_s0 + $0x10] sm:$0xff]  ;;  %101 = vperm.xlu1 %833, %v96_v55   ;;  %v33_v61 = vld [vmem:[%s1288_s0 + $0x8] sm:$0xff] }
  0x16   :  { %772 = vmatpush.xpose.msk.msra.mxu2 %vm114_vm0, %v75_v19  ;;  %v83_v54 = vld [vmem:[%s1288_s0 + $0x198] sm:$0xff]  ;;  %v50_v58 = vld [vmem:[%s1288_s0 + $0x90] sm:$0xff]  ;;  %v49_v62 = vld [vmem:[%s1288_s0 + $0x88] sm:$0xff] }
  0x17   :  { %791 = vmatpush.xpose.msk.msra.mxu3 %vm114_vm0, %v91_v20  ;;  %v66_v59 = vld [vmem:[%s1288_s0 + $0x110] sm:$0xff]  ;;  %v65_v63 = vld [vmem:[%s1288_s0 + $0x108] sm:$0xff]  ;;  %v593_v2 = vld [vmem:[#allocation2] sm:$0x1] }
  0x18   :  { %735 = vmatpush.xpose.msk.msra.mxu0 %vm114_vm0, %v42_v21  ;;  %v82_v60 = vld [vmem:[%s1288_s0 + $0x190] sm:$0xff]  ;;  %v81_v0 = vld [vmem:[%s1288_s0 + $0x188] sm:$0xff]  ;;  %v32_v3 = vld [vmem:[%s1288_s0] sm:$0xff] }
  0x19   :  { %754 = vmatpush.xpose.msk.msra.mxu1 %vm114_vm0, %v58_v22  ;;  %v437_v1 = vld [vmem:[%s1292_s4 + $0x10] sm:$0xf]  ;;  %v48_v4 = vld [vmem:[%s1288_s0 + $0x80] sm:$0xff]  ;;  %v30_v8 = vld [vmem:[%s1289_s1 + $0x8] sm:$0xff] }
  0x1a   :  { %773 = vmatpush.xpose.msk.msra.mxu2 %vm114_vm0, %v74_v23  ;;  %v64_v5 = vld [vmem:[%s1288_s0 + $0x100] sm:$0xff]  ;;  %v31_v9 = vld [vmem:[%s1289_s1 + $0x10] sm:$0xf] }
  0x1b   :  { %792 = vmatpush.xpose.msk.msra.mxu3 %vm114_vm0, %v90_v24  ;;  %v80_v6 = vld [vmem:[%s1288_s0 + $0x180] sm:$0xff] }
  0x1c   :  { %736 = vmatpush.xpose.msk.msra.mxu0 %vm114_vm0, %v41_v25  ;;  %106 = vperm.xlu0 %832, %v97_v56   ;;  %v29_v7 = vld [vmem:[%s1289_s1] sm:$0xff] }
  0x1d   :  { %755 = vmatpush.xpose.msk.msra.mxu1 %vm114_vm0, %v57_v26  ;;  %450 = vperm.xlu1 %833, %v437_v1   ;;  %v435_v45 = vld [vmem:[%s1292_s4] sm:$0xff] }
  0x1e   :  { %774 = vmatpush.xpose.msk.msra.mxu2 %vm114_vm0, %v73_v27 }
  0x1f   :  { %793 = vmatpush.xpose.msk.msra.mxu3 %vm114_vm0, %v89_v28 }
  0x20   :  { %737 = vmatpush.xpose.msk.msra.mxu0 %vm114_vm0, %v40_v29 }
  0x21   :  { %756 = vmatpush.xpose.msk.msra.mxu1 %vm114_vm0, %v56_v30 }
  0x22   :  { %775 = vmatpush.xpose.msk.msra.mxu2 %vm114_vm0, %v72_v31  ;;  %v436_v31 = vld [vmem:[%s1292_s4 + $0x8] sm:$0xff] }
  0x23   :  { %794 = vmatpush.xpose.msk.msra.mxu3 %vm114_vm0, %v88_v32  ;;  %445 = vperm.xlu2 %834, %v436_v31  }
  0x24   :  { %738 = vmatpush.xpose.msk.msra.mxu0 %vm114_vm0, %v39_v33  ;;  %596 = vperm.xlu0 %832, %v593_v2  }
  0x25   :  { %757 = vmatpush.xpose.msk.msra.mxu1 %vm114_vm0, %v55_v34 }
  0x26   :  { %776 = vmatpush.xpose.msk.msra.mxu2 %vm114_vm0, %v71_v35 }
  0x27   :  { %795 = vmatpush.xpose.msk.msra.mxu3 %vm114_vm0, %v87_v36 }
  0x28   :  { %739 = vmatpush.xpose.msk.msra.mxu0 %vm114_vm0, %v38_v37 }
  0x29   :  { %758 = vmatpush.xpose.msk.msra.mxu1 %vm114_vm0, %v54_v38 }
  0x2a   :  { %777 = vmatpush.xpose.msk.msra.mxu2 %vm114_vm0, %v70_v39 }
  0x2b   :  { %796 = vmatpush.xpose.msk.msra.mxu3 %vm114_vm0, %v86_v40  ;;  %440 = vperm.xlu2 %834, %v435_v45  }
  0x2c   :  { %740 = vmatpush.xpose.msk.msra.mxu0 %vm114_vm0, %v37_v41 }
  0x2d   :  { %759 = vmatpush.xpose.msk.msra.mxu1 %vm114_vm0, %v53_v42 }
  0x2e   :  { %778 = vmatpush.xpose.msk.msra.mxu2 %vm114_vm0, %v69_v43  ;;  %v432_v43 = vld [vmem:[%s1291_s3] sm:$0xff] }
  0x2f   :  { %797 = vmatpush.xpose.msk.msra.mxu3 %vm114_vm0, %v85_v44 }
  0x30   :  { %741 = vmatpush.xpose.msk.msra.mxu0 %vm114_vm0, %v36_v46 }
  0x31   :  { %760 = vmatpush.xpose.msk.msra.mxu1 %vm114_vm0, %v52_v47 }
  0x32   :  { %779 = vmatpush.xpose.msk.msra.mxu2 %vm114_vm0, %v68_v48 }
  0x33   :  { %798 = vmatpush.xpose.msk.msra.mxu3 %vm114_vm0, %v84_v49 }
  0x34   :  { %742 = vmatpush.xpose.msk.msra.mxu0 %vm114_vm0, %v35_v51 }
  0x35   :  { %761 = vmatpush.xpose.msk.msra.mxu1 %vm114_vm0, %v51_v52  ;;  %v433_v52 = vld [vmem:[%s1291_s3 + $0x8] sm:$0xff] }
  0x36   :  { %780 = vmatpush.xpose.msk.msra.mxu2 %vm114_vm0, %v67_v53  ;;  %v434_v53 = vld [vmem:[%s1291_s3 + $0x10] sm:$0xf] }
  0x37   :  { %799 = vmatpush.xpose.msk.msra.mxu3 %vm114_vm0, %v83_v54 }
  0x38   :  { %743 = vmatpush.xpose.msk.msra.mxu0 %vm114_vm0, %v34_v57 }
  0x39   :  { %762 = vmatpush.xpose.msk.msra.mxu1 %vm114_vm0, %v50_v58 }
  0x3a   :  { %781 = vmatpush.xpose.msk.msra.mxu2 %vm114_vm0, %v66_v59 }
  0x3b   :  { %800 = vmatpush.xpose.msk.msra.mxu3 %vm114_vm0, %v82_v60 }
  0x3c   :  { %744 = vmatpush.xpose.msk.msra.mxu0 %vm114_vm0, %v33_v61 }
  0x3d   :  { %763 = vmatpush.xpose.msk.msra.mxu1 %vm114_vm0, %v49_v62 }
  0x3e   :  { %782 = vmatpush.xpose.msk.msra.mxu2 %vm114_vm0, %v65_v63 }
  0x3f   :  { %801 = vmatpush.xpose.msk.msra.mxu3 %vm114_vm0, %v81_v0 }
  0x40   :  { %745 = vmatpush.xpose.msk.msra.mxu0 %vm114_vm0, %v32_v3 }
  0x41   :  { %764 = vmatpush.xpose.msk.msra.mxu1 %vm114_vm0, %v48_v4 }
  0x42   :  { %783 = vmatpush.xpose.msk.msra.mxu2 %vm114_vm0, %v64_v5 }
  0x43   :  { %802 = vmatpush.xpose.msk.msra.mxu3 %vm114_vm0, %v80_v6  ;;  %746 = vmatmul.msk.f32.vlgmr.msra.gmra.mxu0 %vm114_vm0, %v29_v7 }
  0x44   :  { %765 = vmatmul.msk.f32.vlgmr.msra.gmra.mxu1 %vm114_vm0, %v29_v7 }
  0x45   :  { %784 = vmatmul.msk.f32.vlgmr.msra.gmra.mxu2 %vm114_vm0, %v29_v7 }
  0x46   :  { %803 = vmatmul.msk.f32.vlgmr.msra.gmra.mxu3 %vm114_vm0, %v29_v7 }
  0x4b   :  { %747 = vmatmul.msk.f32.gmra.mxu0 %vm114_vm0, %v30_v8 }
  0x4c   :  { %766 = vmatmul.msk.f32.gmra.mxu1 %vm114_vm0, %v30_v8 }
  0x4d   :  { %785 = vmatmul.msk.f32.gmra.mxu2 %vm114_vm0, %v30_v8 }
  0x4e   :  { %804 = vmatmul.msk.f32.gmra.mxu3 %vm114_vm0, %v30_v8 }
  0x53   :  { %748 = vmatmul.msk.f32.gmra.mxu0 %vm114_vm0, %v31_v9 }
  0x54   :  { %767 = vmatmul.msk.f32.gmra.mxu1 %vm114_vm0, %v31_v9 }
  0x55   :  { %786 = vmatmul.msk.f32.gmra.mxu2 %vm114_vm0, %v31_v9 }
  0x56   :  { %805 = vmatmul.msk.f32.gmra.mxu3 %vm114_vm0, %v31_v9 }
  0x7d   :  { %v446_v56 = vpop.permute.xlu2 %445 }
  0x85   :  { %v441_v0 = vpop.permute.xlu2 %440 }
  0x86   :  { %v112_v12 = vpop.permute.xlu0 %111 }
  0x87   :  { %v102_v17 = vpop.permute.xlu1 %101 }
  0x8e   :  { %v107_v23 = vpop.permute.xlu0 %106 }
  0x8f   :  { %v451_v63 = vpop.permute.xlu1 %450 }
  0xc0   :  { %v333_v10 = vpop.f32.mrf.mxu0 }
  0xc1   :  { %v359_v11 = vpop.f32.mrf.mxu1  ;;  %v334_v18 = vadd.f32 %v333_v10, %v102_v17 }
  0xc2   :  { %v360_v28 = vadd.f32 %v359_v11, %v102_v17 }
  0xc3   :  { %835 = vtanh.f32 %v334_v18 }
  0xc8   :  { %v385_v13 = vpop.f32.mrf.mxu2  ;;  %v336_v15 = vpop.f32.mrf.mxu0 }
  0xc9   :  { %v411_v14 = vpop.f32.mrf.mxu3  ;;  %v362_v16 = vpop.f32.mrf.mxu1  ;;  %v337_v26 = vadd.f32 %v336_v15, %v107_v23  ;;  %v386_v38 = vadd.f32 %v385_v13, %v102_v17  ;;  %v592_v15 = vld [vmem:[%s1293_s5] sm:$0x1] }
  0xca   :  { %v363_v27 = vadd.f32 %v362_v16, %v107_v23  ;;  %v836_v35 = vpop.eup %835  ;;  %v412_v40 = vadd.f32 %v411_v14, %v102_v17 }
  0xd0   :  { %v388_v19 = vpop.f32.mrf.mxu2  ;;  %v339_v21 = vpop.f32.mrf.mxu0 }
  0xd1   :  { %v414_v20 = vpop.f32.mrf.mxu3  ;;  %v365_v22 = vpop.f32.mrf.mxu1  ;;  %v340_v24 = vadd.f32 %v339_v21, %v112_v12  ;;  %v389_v32 = vadd.f32 %v388_v19, %v107_v23 }
  0xd2   :  { %v366_v25 = vadd.f32 %v365_v22, %v112_v12  ;;  %v415_v36 = vadd.f32 %v414_v20, %v107_v23 }
  0xd3   :  { %837 = vtanh.f32 %v340_v24 }
  0xd4   :  { %839 = vtanh.f32 %v366_v25 }
  0xd5   :  { %841 = vtanh.f32 %v337_v26 }
  0xd6   :  { %843 = vtanh.f32 %v363_v27 }
  0xd7   :  { %845 = vtanh.f32 %v360_v28 }
  0xd8   :  { %v391_v29 = vpop.f32.mrf.mxu2 }
  0xd9   :  { %v417_v30 = vpop.f32.mrf.mxu3  ;;  %v392_v33 = vadd.f32 %v391_v29, %v112_v12  ;;  %v838_v37 = vpop.eup %837 }
  0xda   :  { %v418_v34 = vadd.f32 %v417_v30, %v112_v12  ;;  %v840_v39 = vpop.eup %839  ;;  %806 = vmatpush.msk.msrb.mxu0 %vm463_vm1, %v838_v37  ;;  %v597_v30 = vpop.permute.xlu0 %596 }
  0xdb   :  { %847 = vtanh.f32 %v392_v33  ;;  %v842_v41 = vpop.eup %841  ;;  %810 = vmatpush.msk.msrb.mxu1 %vm463_vm1, %v840_v39 }
  0xdc   :  { %849 = vtanh.f32 %v418_v34  ;;  %v844_v42 = vpop.eup %843  ;;  %490 = vmatpush.msrb.mxu0 %v842_v41 }
  0xdd   :  { %851 = vtanh.f32 %v389_v32  ;;  %516 = vmatpush.msrb.mxu1 %v844_v42  ;;  %v846_v44 = vpop.eup %845  ;;  %v599_v32 = vperm.slane %v597_v30, 0 }
  0xde   :  { %853 = vtanh.f32 %v415_v36  ;;  %491 = vmatpush.msrb.mxu0 %v836_v35 }
  0xdf   :  { %855 = vtanh.f32 %v386_v38  ;;  %517 = vmatpush.msrb.mxu1 %v846_v44  ;;  %807 = vmatmul.msk.f32.vlgmr.msrb.gmra.mxu0 %vm453_vm2, %v432_v43  ;;  %v709_v38 = vlaneseq }
  0xe0   :  { %857 = vtanh.f32 %v412_v40  ;;  %811 = vmatmul.msk.f32.vlgmr.msrb.gmra.mxu1 %vm453_vm2, %v432_v43 }
  0xe1   :  { %v848_v46 = vpop.eup %847  ;;  %vm711_vm6 = vcmp.lt.s32.totalorder %v709_v38, 512 }
  0xe2   :  { %v850_v47 = vpop.eup %849  ;;  %814 = vmatpush.msk.msrb.mxu2 %vm463_vm1, %v848_v46 }
  0xe3   :  { %v852_v48 = vpop.eup %851  ;;  %818 = vmatpush.msk.msrb.mxu3 %vm463_vm1, %v850_v47 }
  0xe4   :  { %v854_v49 = vpop.eup %853  ;;  %542 = vmatpush.msrb.mxu2 %v852_v48 }
  0xe5   :  { %v856_v50 = vpop.eup %855  ;;  %568 = vmatpush.msrb.mxu3 %v854_v49 }
  0xe6   :  { %v858_v51 = vpop.eup %857  ;;  %543 = vmatpush.msrb.mxu2 %v856_v50 }
  0xe7   :  { %569 = vmatpush.msrb.mxu3 %v858_v51  ;;  %815 = vmatmul.msk.f32.vlgmr.msrb.gmra.mxu2 %vm453_vm2, %v432_v43 }
  0xe8   :  { %819 = vmatmul.msk.f32.vlgmr.msrb.gmra.mxu3 %vm453_vm2, %v432_v43  ;;  %808 = vmatmul.msk.f32.gmra.mxu0 %vm453_vm2, %v433_v52 }
  0xe9   :  { %812 = vmatmul.msk.f32.gmra.mxu1 %vm453_vm2, %v433_v52 }
  0xef   :  { %816 = vmatmul.msk.f32.gmra.mxu2 %vm453_vm2, %v433_v52 }
  0xf0   :  { %820 = vmatmul.msk.f32.gmra.mxu3 %vm453_vm2, %v433_v52  ;;  %809 = vmatmul.msk.f32.gmra.mxu0 %vm453_vm2, %v434_v53 }
  0xf1   :  { %813 = vmatmul.msk.f32.gmra.mxu1 %vm453_vm2, %v434_v53 }
  0xf7   :  { %817 = vmatmul.msk.f32.gmra.mxu2 %vm453_vm2, %v434_v53 }
  0xf8   :  { %821 = vmatmul.msk.f32.gmra.mxu3 %vm453_vm2, %v434_v53 }
 0x15c   :  { %v493_v54 = vpop.f32.mrf.mxu0 }
 0x15d   :  { %v519_v55 = vpop.f32.mrf.mxu1  ;;  %v494_v2 = vadd.f32 %v493_v54, %v441_v0 }
 0x15e   :  { %v520_v6 = vadd.f32 %v519_v55, %v441_v0 }
 0x165   :  { %v496_v57 = vpop.f32.mrf.mxu0 }
 0x166   :  { %v522_v58 = vpop.f32.mrf.mxu1  ;;  %v497_v60 = vadd.f32 %v496_v57, %v446_v56 }
 0x167   :  { %v523_v62 = vadd.f32 %v522_v58, %v446_v56 }
 0x168   :  { %859 = vtanh.f32 %v497_v60 }
 0x169   :  { %861 = vtanh.f32 %v523_v62 }
 0x16a   :  { %v545_v59 = vpop.f32.mrf.mxu2 }
 0x16b   :  { %v571_v61 = vpop.f32.mrf.mxu3  ;;  %v546_v22 = vadd.f32 %v545_v59, %v441_v0 }
 0x16c   :  { %v572_v23 = vadd.f32 %v571_v61, %v441_v0 }
 0x16d   :  { %v499_v1 = vpop.f32.mrf.mxu0 }
 0x16e   :  { %v500_v3 = vadd.f32 %v499_v1, %v451_v63  ;;  %v525_v4 = vpop.f32.mrf.mxu1  ;;  %v860_v9 = vpop.eup %859 }
 0x16f   :  { %v526_v5 = vadd.f32 %v525_v4, %v451_v63  ;;  %v862_v10 = vpop.eup %861 }
 0x170   :  { %863 = vtanh.f32 %v500_v3 }
 0x171   :  { %865 = vtanh.f32 %v526_v5 }
 0x172   :  { %v548_v7 = vpop.f32.mrf.mxu2  ;;  %867 = vtanh.f32 %v494_v2 }
 0x173   :  { %v574_v8 = vpop.f32.mrf.mxu3  ;;  %869 = vtanh.f32 %v520_v6  ;;  %v549_v16 = vadd.f32 %v548_v7, %v446_v56 }
 0x174   :  { %v575_v20 = vadd.f32 %v574_v8, %v446_v56 }
 0x176   :  { %v864_v11 = vpop.eup %863 }
 0x177   :  { %v866_v12 = vpop.eup %865  ;;  %822 = vmatpush.msk.msra.mxu0 %vm463_vm1, %v864_v11 }
 0x178   :  { %v868_v13 = vpop.eup %867  ;;  %824 = vmatpush.msk.msra.mxu1 %vm463_vm1, %v866_v12 }
 0x179   :  { %629 = vmatpush.msra.mxu0 %v860_v9  ;;  %v870_v19 = vpop.eup %869 }
 0x17a   :  { %v551_v14 = vpop.f32.mrf.mxu2  ;;  %649 = vmatpush.msra.mxu1 %v862_v10 }
 0x17b   :  { %v552_v17 = vadd.f32 %v551_v14, %v451_v63  ;;  %v577_v18 = vpop.f32.mrf.mxu3  ;;  %630 = vmatpush.msra.mxu0 %v868_v13 }
 0x17c   :  { %v578_v21 = vadd.f32 %v577_v18, %v451_v63  ;;  %650 = vmatpush.msra.mxu1 %v870_v19  ;;  %823 = vmatmul.msk.f32.vlgmr.msra.gmra.mxu0 %vm453_vm2, %v592_v15 }
 0x17d   :  { %871 = vtanh.f32 %v552_v17  ;;  %825 = vmatmul.msk.f32.vlgmr.msra.gmra.mxu1 %vm453_vm2, %v592_v15 }
 0x17e   :  { %873 = vtanh.f32 %v578_v21 }
 0x17f   :  { %875 = vtanh.f32 %v549_v16 }
 0x180   :  { %877 = vtanh.f32 %v575_v20 }
 0x181   :  { %879 = vtanh.f32 %v546_v22 }
 0x182   :  { %881 = vtanh.f32 %v572_v23 }
 0x183   :  { %v872_v24 = vpop.eup %871 }
 0x184   :  { %v874_v25 = vpop.eup %873  ;;  %826 = vmatpush.msk.msra.mxu2 %vm463_vm1, %v872_v24 }
 0x185   :  { %v876_v26 = vpop.eup %875  ;;  %828 = vmatpush.msk.msra.mxu3 %vm463_vm1, %v874_v25 }
 0x186   :  { %v878_v27 = vpop.eup %877  ;;  %669 = vmatpush.msra.mxu2 %v876_v26 }
 0x187   :  { %v880_v28 = vpop.eup %879  ;;  %689 = vmatpush.msra.mxu3 %v878_v27 }
 0x188   :  { %v882_v29 = vpop.eup %881  ;;  %670 = vmatpush.msra.mxu2 %v880_v28 }
 0x189   :  { %690 = vmatpush.msra.mxu3 %v882_v29  ;;  %827 = vmatmul.msk.f32.vlgmr.msra.gmra.mxu2 %vm453_vm2, %v592_v15 }
 0x18a   :  { %829 = vmatmul.msk.f32.vlgmr.msra.gmra.mxu3 %vm453_vm2, %v592_v15 }
 0x1f9   :  { %v632_v35 = vpop.f32.mrf.mxu0 }
 0x1fa   :  { %v652_v31 = vpop.f32.mrf.mxu1  ;;  %v633_v42 = vadd.f32 %v632_v35, %v599_v32 }
 0x1fb   :  { %v653_v33 = vadd.f32 %v652_v31, %v599_v32 }
 0x1fd   :  { %v699_v39 = vrot.slane %v653_v33, 7 }
 0x1ff   :  { %v703_v44 = vsel %vm702_vm3, %v633_v42, %v699_v39 }
 0x20c   :  { %v672_v34 = vpop.f32.mrf.mxu2 }
 0x20d   :  { %v673_v36 = vadd.f32 %v672_v34, %v599_v32  ;;  %v692_v37 = vpop.f32.mrf.mxu3 }
 0x20e   :  { %v693_v40 = vadd.f32 %v692_v37, %v599_v32 }
 0x20f   :  { %v700_v41 = vrot.slane %v673_v36, 6 }
 0x210   :  { %v701_v43 = vrot.slane %v693_v40, 5 }
 0x212   :  { %v705_v45 = vsel %vm704_vm4, %v700_v41, %v701_v43 }
 0x213   :  { %v707_v46 = vsel %vm706_vm5, %v703_v44, %v705_v45 }
 0x214   :  { %713 = vst.msk [vmem:[#allocation3] sm:$0xf] %vm711_vm6, %v707_v46 }
 0x215   :  { %717 = vsyncadd [#allocation4], 32  ;;  %s721_s8 = sshll.u32 %s1295_s7, 4  ;;  %s910_s6 = smov [#allocation3]   ;;  %s722_s8 = int_to_ptr.hbm [resolvable:$true] %s721_s8 }
 0x216   :  { %s719_s9 = sshll.u32 %s910_s6, 4  ;;  %s720_s9 = int_to_ptr.vmem [resolvable:$true] %s719_s9 }
 0x217   :  { %724 = dma.vmem_to_hbm [thread:$0]  %s720_s9, 32, %s722_s8, [#allocation4]  }
 0x218   :  { %907 = dma.done.wait [#allocation4], 64  }
 0x219   :  { %908 = vsyncadd [#allocation4], 4294967232 }
 0x21a   :  { %729 = vsyncpa [#allocation4], 1 }

</bundles_post_ra>
